<compile_context>
chip_gen: v7x
topology: tpu7x:2x2x1
jax: 0.10.0
libtpu: 0.0.40
codegen_flags: <defaults>
</compile_context>

<pallas_src>
import jax
import jax.numpy as jnp
from jax.experimental import pallas as pl
from jax.experimental.pallas import tpu as pltpu

NEG_SLOPE = 0.2


def _leaky_relu(y):
    # 2 VALU ops/elem (mul + max) instead of cmp+select+mul.
    return jnp.maximum(y, NEG_SLOPE * y)


def _round_up(n, m):
    return (n + m - 1) // m * m


def _disc_kernel(x_ref, w1_ref, b1_ref, w2_ref, b2_ref, w3_ref, b3_ref,
                 out_ref):
    """Fused FC(F,512)+LReLU -> FC(512,256)+LReLU -> FC(256,1)+LReLU."""
    # x arrives f32; cast to bf16 here (hidden under MXU work) for the MXU.
    x = x_ref[...].astype(jnp.bfloat16)                        # (TB, F)

    h1 = jnp.dot(x, w1_ref[...], preferred_element_type=jnp.float32)
    # Fuse LeakyReLU + bf16 downcast so only the bf16 copy of h1 stays live.
    h1 = _leaky_relu(h1 + b1_ref[...]).astype(jnp.bfloat16)    # (TB, 512) bf16

    h2 = jnp.dot(h1, w2_ref[...], preferred_element_type=jnp.float32)
    h2 = _leaky_relu(h2 + b2_ref[...])                         # (TB, 256) f32

    # Layer 3 has a single output unit: VPU multiply + XLU lane reduction.
    w3 = w3_ref[...].astype(jnp.float32)                       # (1, 256)
    h3 = jnp.sum(h2 * w3, axis=-1, keepdims=True) + b3_ref[...]
    out_ref[...] = _leaky_relu(h3).astype(out_ref.dtype)


def _vmem_capacity_bytes():
    """Physical VMEM of the local TPU; conservative fallback = 64 MiB (v7x)."""
    try:
        info = pltpu.get_tpu_info()
        cap = getattr(info, "vmem_capacity_bytes", None)
        if cap:
            return int(cap)
    except Exception:
        pass
    return 64 << 20


def _pick_tb(B):
    """Batch tile: big enough to amortize ~600-cycle/step overhead,
    >= 2 grid steps for large batches (v7x megacore), legal (8,128) shapes."""
    if B <= 8:
        return B                        # block dim == full array dim is legal
    if B <= 256:
        return _round_up(B, 8)          # tiny problem: one step is fine
    return min(1024, _round_up(pl.cdiv(B, 2), 8))


@jax.jit
def discriminator_forward(x, params):
    """x: (B, ...) -> flattened to (B, F). Returns (B, 1) float32."""
    B = x.shape[0]
    x2d = x.reshape((B, -1)).astype(jnp.float32)   # native f32, no bf16 pass
    F = x2d.shape[1]

    (w1, b1), (w2, b2), (w3, b3) = params
    H1 = w1.shape[1]   # 512
    H2 = w2.shape[1]   # 256

    # Small, reused-every-step weights: cast once outside the kernel.
    w1b = w1.astype(jnp.bfloat16)                              # (F, 512)
    w2b = w2.astype(jnp.bfloat16)                              # (512, 256)
    w3_row = jnp.transpose(w3).astype(jnp.bfloat16)            # (1, 256)
    b1r = b1.astype(jnp.float32)                               # (1, 512)
    b2r = b2.astype(jnp.float32)                               # (1, 256)
    b3r = b3.astype(jnp.float32)                               # (1, 1)

    TB = _pick_tb(B)

    vmem_cap = _vmem_capacity_bytes()
    budget = int(0.70 * vmem_cap)      # leave headroom for compiler scratch

    def est(tb):
        return ((F * H1 + H1 * H2 + H2) * 2        # bf16 weights (resident)
                + (H1 + H2 + 1) * 4                # f32 biases
                + 2 * tb * F * 4                   # f32 x tiles, double-buffered
                + 2 * tb * 128 * 4                 # out tiles (lane-padded), dbl-buf
                + tb * H1 * (4 + 2)                # h1: f32 + fused bf16 copy
                + tb * H2 * 4                      # h2 f32
                + (2 << 20))                       # slack

    while TB > 8 and est(TB) > budget:
        TB = max(8, _round_up(TB // 2, 8))
    # TODO(synk): if in_features grows so large that F*H1*2 bytes is a big
    # fraction of VMEM, tile w1 along K with an 'arbitrary' grid axis and an
    # f32 accumulator instead of keeping it fully resident.

    vmem_limit = min(int(0.90 * vmem_cap),
                     max(int(1.5 * est(TB)), 32 << 20))

    resident = pl.BlockSpec(memory_space=pltpu.MemorySpace.VMEM)

    out = pl.pallas_call(
        _disc_kernel,
        out_shape=jax.ShapeDtypeStruct((B, 1), jnp.float32),
        grid=(pl.cdiv(B, TB),),
        in_specs=[
            pl.BlockSpec((TB, F), lambda i: (i, 0)),   # x (pipelined over B)
            resident,                                  # w1 (VMEM-resident)
            resident,                                  # b1
            resident,                                  # w2
            resident,                                  # b2
            resident,                                  # w3 row
            resident,                                  # b3
        ],
        out_specs=pl.BlockSpec((TB, 1), lambda i: (i, 0)),
        compiler_params=pltpu.CompilerParams(
            dimension_semantics=("parallel",),
            vmem_limit_bytes=vmem_limit),
    )(x2d, w1b, b1r, w2b, b2r, w3_row, b3r)

    return out


def init_params(key, in_features):
    """Deterministic synthetic parameters (PyTorch init, stored transposed)."""
    dims = [(in_features, 512), (512, 256), (256, 1)]
    params = []
    for (fan_in, fan_out) in dims:
        key, kw, kb = jax.random.split(key, 3)
        bound = 1.0 / jnp.sqrt(jnp.float32(fan_in))
        # PyTorch nn.Linear weight is (out, in); store transposed (in, out).
        w_pt = jax.random.uniform(kw, (fan_out, fan_in), jnp.float32,
                                  -bound, bound)
        b_pt = jax.random.uniform(kb, (fan_out,), jnp.float32, -bound, bound)
        params.append((jnp.transpose(w_pt), b_pt.reshape(1, fan_out)))
    return params


def reference_forward(x, params):
    """Plain-JAX reference mirroring the kernel's bf16/f32 arithmetic."""
    (w1, b1), (w2, b2), (w3, b3) = params
    h = x.reshape((x.shape[0], -1)).astype(jnp.bfloat16)
    h1 = jnp.dot(h, w1.astype(jnp.bfloat16),
                 preferred_element_type=jnp.float32) + b1.astype(jnp.float32)
    h1 = jnp.maximum(h1, NEG_SLOPE * h1).astype(jnp.bfloat16)
    h2 = jnp.dot(h1, w2.astype(jnp.bfloat16),
                 preferred_element_type=jnp.float32) + b2.astype(jnp.float32)
    h2 = jnp.maximum(h2, NEG_SLOPE * h2)
    w3f = w3.astype(jnp.bfloat16).astype(jnp.float32)          # (256, 1)
    h3 = jnp.dot(h2, w3f) + b3.astype(jnp.float32)
    return jnp.maximum(h3, NEG_SLOPE * h3)


if __name__ == "__main__":
    key = jax.random.PRNGKey(0)
    k_x, k_p, k_x2 = jax.random.split(key, 3)

    # Small shapes: batch=2, 64 points x 3 coords => in_features = 192.
    B, N, C = 2, 64, 3
    x = jax.random.normal(k_x, (B, N, C), jnp.float32)
    params = init_params(k_p, in_features=N * C)

    out = jax.block_until_ready(discriminator_forward(x, params))
    ref = reference_forward(x, params)
    assert out.shape == (B, 1), out.shape
    assert jnp.allclose(out, ref, atol=1e-2, rtol=1e-2), (out, ref)

    # Also exercise the multi-tile + ragged-tail path (B not multiple of TB).
    B2 = 300
    x2 = jax.random.normal(k_x2, (B2, N, C), jnp.float32)
    out2 = jax.block_until_ready(discriminator_forward(x2, params))
    ref2 = reference_forward(x2, params)
    assert out2.shape == (B2, 1), out2.shape
    assert jnp.allclose(out2, ref2, atol=1e-2, rtol=1e-2)

    print("KERNEL_OK")
</pallas_src>

<mosaic_0001>
module attributes {stable_mosaic.version = 11 : i64} {
  func.func @_disc_kernel(%arg0: i32, %arg1: memref<2x192xf32, #tpu.memory_space<vmem>>, %arg2: memref<192x512xbf16, #tpu.memory_space<vmem>>, %arg3: memref<1x512xf32, #tpu.memory_space<vmem>>, %arg4: memref<512x256xbf16, #tpu.memory_space<vmem>>, %arg5: memref<1x256xf32, #tpu.memory_space<vmem>>, %arg6: memref<1x256xbf16, #tpu.memory_space<vmem>>, %arg7: memref<1x1xf32, #tpu.memory_space<vmem>>, %arg8: memref<2x1xf32, #tpu.memory_space<vmem>>) attributes {dimension_semantics = [#tpu.dimension_semantics<parallel>], iteration_bounds = array<i64: 1>, scalar_prefetch = 0 : i64, scratch_operands = 0 : i64, tpu.core_type = #tpu.core_type<tc>, window_params = [{transform_indices = @transform_0, window_bounds = array<i64: 2, 192>}, {pipeline_mode = #tpu.pipeline_mode<synchronous>, transform_indices = @transform_1, window_bounds = array<i64: 192, 512>}, {pipeline_mode = #tpu.pipeline_mode<synchronous>, transform_indices = @transform_2, window_bounds = array<i64: 1, 512>}, {pipeline_mode = #tpu.pipeline_mode<synchronous>, transform_indices = @transform_3, window_bounds = array<i64: 512, 256>}, {pipeline_mode = #tpu.pipeline_mode<synchronous>, transform_indices = @transform_4, window_bounds = array<i64: 1, 256>}, {pipeline_mode = #tpu.pipeline_mode<synchronous>, transform_indices = @transform_5, window_bounds = array<i64: 1, 256>}, {pipeline_mode = #tpu.pipeline_mode<synchronous>, transform_indices = @transform_6, window_bounds = array<i64: 1, 1>}, {transform_indices = @transform_7, window_bounds = array<i64: 2, 1>}]} {
    %c0 = arith.constant 0 : index
    %c0_0 = arith.constant 0 : index
    %0 = vector.load %arg1[%c0, %c0_0] : memref<2x192xf32, #tpu.memory_space<vmem>>, vector<2x192xf32>
    %1 = arith.truncf %0 : vector<2x192xf32> to vector<2x192xbf16>
    %c0_1 = arith.constant 0 : index
    %c0_2 = arith.constant 0 : index
    %2 = vector.load %arg2[%c0_1, %c0_2] : memref<192x512xbf16, #tpu.memory_space<vmem>>, vector<192x512xbf16>
    %cst = arith.constant dense<0.000000e+00> : vector<2x512xf32>
    %3 = tpu.matmul %1, %2, %cst {dimension_numbers = #tpu.dot_dimension_numbers<[1], [0], [0], [1], [0, 0, 1, 1], [], []>} : vector<2x192xbf16>, vector<192x512xbf16>, vector<2x512xf32> -> vector<2x512xf32>
    %c0_3 = arith.constant 0 : index
    %c0_4 = arith.constant 0 : index
    %4 = vector.load %arg3[%c0_3, %c0_4] : memref<1x512xf32, #tpu.memory_space<vmem>>, vector<1x512xf32>
    %5 = vector.broadcast %4 : vector<1x512xf32> to vector<2x512xf32>
    %6 = arith.addf %3, %5 : vector<2x512xf32>
    %cst_5 = arith.constant 2.000000e-01 : f32
    %7 = vector.broadcast %cst_5 : f32 to vector<2x512xf32>
    %8 = arith.mulf %7, %6 : vector<2x512xf32>
    %9 = arith.maximumf %6, %8 : vector<2x512xf32>
    %10 = arith.truncf %9 : vector<2x512xf32> to vector<2x512xbf16>
    %c0_6 = arith.constant 0 : index
    %c0_7 = arith.constant 0 : index
    %11 = vector.load %arg4[%c0_6, %c0_7] : memref<512x256xbf16, #tpu.memory_space<vmem>>, vector<512x256xbf16>
    %cst_8 = arith.constant dense<0.000000e+00> : vector<2x256xf32>
    %12 = tpu.matmul %10, %11, %cst_8 {dimension_numbers = #tpu.dot_dimension_numbers<[1], [0], [0], [1], [0, 0, 1, 1], [], []>} : vector<2x512xbf16>, vector<512x256xbf16>, vector<2x256xf32> -> vector<2x256xf32>
    %c0_9 = arith.constant 0 : index
    %c0_10 = arith.constant 0 : index
    %13 = vector.load %arg5[%c0_9, %c0_10] : memref<1x256xf32, #tpu.memory_space<vmem>>, vector<1x256xf32>
    %14 = vector.broadcast %13 : vector<1x256xf32> to vector<2x256xf32>
    %15 = arith.addf %12, %14 : vector<2x256xf32>
    %cst_11 = arith.constant 2.000000e-01 : f32
    %16 = vector.broadcast %cst_11 : f32 to vector<2x256xf32>
    %17 = arith.mulf %16, %15 : vector<2x256xf32>
    %18 = arith.maximumf %15, %17 : vector<2x256xf32>
    %c0_12 = arith.constant 0 : index
    %c0_13 = arith.constant 0 : index
    %19 = vector.load %arg6[%c0_12, %c0_13] : memref<1x256xbf16, #tpu.memory_space<vmem>>, vector<1x256xbf16>
    %20 = arith.extf %19 : vector<1x256xbf16> to vector<1x256xf32>
    %21 = vector.broadcast %20 : vector<1x256xf32> to vector<2x256xf32>
    %22 = arith.mulf %18, %21 : vector<2x256xf32>
    %cst_14 = arith.constant dense<0.000000e+00> : vector<2xf32>
    %23 = vector.multi_reduction <add>, %22, %cst_14 [1] : vector<2x256xf32> to vector<2xf32>
    %24 = vector.shape_cast %23 : vector<2xf32> to vector<2x1xf32>
    %c0_15 = arith.constant 0 : index
    %c0_16 = arith.constant 0 : index
    %25 = vector.load %arg7[%c0_15, %c0_16] : memref<1x1xf32, #tpu.memory_space<vmem>>, vector<1x1xf32>
    %26 = vector.broadcast %25 : vector<1x1xf32> to vector<2x1xf32>
    %27 = arith.addf %24, %26 : vector<2x1xf32>
    %cst_17 = arith.constant 2.000000e-01 : f32
    %28 = vector.broadcast %cst_17 : f32 to vector<2x1xf32>
    %29 = arith.mulf %28, %27 : vector<2x1xf32>
    %30 = arith.maximumf %27, %29 : vector<2x1xf32>
    %c0_18 = arith.constant 0 : index
    %c0_19 = arith.constant 0 : index
    %31 = vector.load %arg8[%c0_18, %c0_19] : memref<2x1xf32, #tpu.memory_space<vmem>>, vector<2x1xf32>
    tpu.vector_store %arg8[%c0_18, %c0_19], %30 {strides = array<i32>} : memref<2x1xf32, #tpu.memory_space<vmem>>, vector<2x1xf32>,
    return
  }
  func.func @transform_0(%arg0: i32) -> (i32, i32) {
    %c0_i32 = arith.constant 0 : i32
    %c0_i32_0 = arith.constant 0 : i32
    return %arg0, %c0_i32 : i32, i32
  }
  func.func @transform_1(%arg0: i32) -> (i32, i32) {
    %c0_i32 = arith.constant 0 : i32
    %c0_i32_0 = arith.constant 0 : i32
    %c0_i32_1 = arith.constant 0 : i32
    return %c0_i32, %c0_i32_0 : i32, i32
  }
  func.func @transform_2(%arg0: i32) -> (i32, i32) {
    %c0_i32 = arith.constant 0 : i32
    %c0_i32_0 = arith.constant 0 : i32
    %c0_i32_1 = arith.constant 0 : i32
    return %c0_i32, %c0_i32_0 : i32, i32
  }
  func.func @transform_3(%arg0: i32) -> (i32, i32) {
    %c0_i32 = arith.constant 0 : i32
    %c0_i32_0 = arith.constant 0 : i32
    %c0_i32_1 = arith.constant 0 : i32
    return %c0_i32, %c0_i32_0 : i32, i32
  }
  func.func @transform_4(%arg0: i32) -> (i32, i32) {
    %c0_i32 = arith.constant 0 : i32
    %c0_i32_0 = arith.constant 0 : i32
    %c0_i32_1 = arith.constant 0 : i32
    return %c0_i32, %c0_i32_0 : i32, i32
  }
  func.func @transform_5(%arg0: i32) -> (i32, i32) {
    %c0_i32 = arith.constant 0 : i32
    %c0_i32_0 = arith.constant 0 : i32
    %c0_i32_1 = arith.constant 0 : i32
    return %c0_i32, %c0_i32_0 : i32, i32
  }
  func.func @transform_6(%arg0: i32) -> (i32, i32) {
    %c0_i32 = arith.constant 0 : i32
    %c0_i32_0 = arith.constant 0 : i32
    %c0_i32_1 = arith.constant 0 : i32
    return %c0_i32, %c0_i32_0 : i32, i32
  }
  func.func @transform_7(%arg0: i32) -> (i32, i32) {
    %c0_i32 = arith.constant 0 : i32
    %c0_i32_0 = arith.constant 0 : i32
    return %arg0, %c0_i32 : i32, i32
  }
}

</mosaic_0001>

<bundles_post_ra>
// kernel: discriminator_forward.1
= control target key start
LH: loop header
LB: loop body
LE: loop exit
PB: predicated region body
PF: predicated region fallthrough
CT: control target
= control target key end

     0   :  { %vm353_vm0 = vcmask 523264   ;;  %vm956_vm1 = vcmask 1041408   ;;  %vm972_vm2 = vcmask 1024   ;;  %s1667_s1 = inlined_call_operand.vmem [shape: bf16[192,512], index: 1, kind: input, shape index: {}]   ;;  %s1668_s0 = inlined_call_operand.vmem [shape: f32[2,192], index: 0, kind: input, shape index: {}]   ;;  %s1669_s3 = inlined_call_operand.vmem [shape: bf16[512,256], index: 3, kind: input, shape index: {}]   ;;  %s1670_s2 = inlined_call_operand.vmem [shape: f32[1,512], index: 2, kind: input, shape index: {}]   ;;  %s1671_s6 = inlined_call_operand.<no memory space> [shape: f32[1,1], index: 6, kind: input, shape index: {}]   ;;  %s1672_s5 = inlined_call_operand.vmem [shape: bf16[1,256], index: 5, kind: input, shape index: {}]   ;;  %s1673_s4 = inlined_call_operand.vmem [shape: f32[1,256], index: 4, kind: input, shape index: {}]   ;;  %s1674_s7 = inlined_call_operand.vmem [shape: f32[2,1], index: 7, kind: output, shape index: {}]  }
   0x1   :  { %v1098_v0 = vld [vmem:[%s1667_s1 + $0x4] ss:$16 sps:$4 sm:$0xff]   ;;  %v1100_v1 = vld [vmem:[%s1667_s1 + $0xc] ss:$16 sps:$4 sm:$0xff]   ;;  %v1102_v2 = vld [vmem:[%s1667_s1] ss:$16 sps:$4 sm:$0xff]  }
   0x2   :  { %357 = vmatprep.subr.bf16.mxu0 %v1098_v0  ;;  %v1103_v3 = vld [vmem:[%s1667_s1 + $0x8] ss:$16 sps:$4 sm:$0xff]   ;;  %398 = vmatprep.subr.bf16.mxu1 %v1100_v1  ;;  %v1104_v4 = vld [vmem:[%s1667_s1 + $0x24] ss:$16 sps:$4 sm:$0xff]   ;;  %v1106_v5 = vld [vmem:[%s1667_s1 + $0x2c] ss:$16 sps:$4 sm:$0xff]  }
   0x3   :  { %358 = vmatpush1.bf16.msra.mxu0 %v1102_v2  ;;  %399 = vmatpush1.bf16.msra.mxu1 %v1103_v3  ;;  %v1108_v6 = vld [vmem:[%s1667_s1 + $0x20] ss:$16 sps:$4 sm:$0xff]   ;;  %v1109_v7 = vld [vmem:[%s1667_s1 + $0x28] ss:$16 sps:$4 sm:$0xff]   ;;  %v1110_v8 = vld [vmem:[%s1667_s1 + $0x44] ss:$16 sps:$4 sm:$0xff]  }
   0x4   :  { %359 = vmatprep.subr.bf16.mxu0 %v1104_v4  ;;  %400 = vmatprep.subr.bf16.mxu1 %v1106_v5  ;;  %v1112_v9 = vld [vmem:[%s1667_s1 + $0x4c] ss:$16 sps:$4 sm:$0xff]   ;;  %v1114_v10 = vld [vmem:[%s1667_s1 + $0x40] ss:$16 sps:$4 sm:$0xff]   ;;  %v1115_v11 = vld [vmem:[%s1667_s1 + $0x48] ss:$16 sps:$4 sm:$0xff]  }
   0x5   :  { %v1116_v12 = vld [vmem:[%s1667_s1 + $0x64] ss:$16 sps:$4 sm:$0xff]   ;;  %v1118_v13 = vld [vmem:[%s1667_s1 + $0x6c] ss:$16 sps:$4 sm:$0xff]   ;;  %v1120_v14 = vld [vmem:[%s1667_s1 + $0x60] ss:$16 sps:$4 sm:$0xff]  }
   0x6   :  { %v1121_v15 = vld [vmem:[%s1667_s1 + $0x68] ss:$16 sps:$4 sm:$0xff]   ;;  %v1122_v16 = vld [vmem:[%s1667_s1 + $0x84] ss:$16 sps:$4 sm:$0xff]   ;;  %v1124_v17 = vld [vmem:[%s1667_s1 + $0x8c] ss:$16 sps:$4 sm:$0xff]  }
   0x7   :  { %360 = vmatpush1.bf16.msra.mxu0 %v1108_v6  ;;  %401 = vmatpush1.bf16.msra.mxu1 %v1109_v7  ;;  %v1126_v18 = vld [vmem:[%s1667_s1 + $0x80] ss:$16 sps:$4 sm:$0xff]   ;;  %v1127_v19 = vld [vmem:[%s1667_s1 + $0x88] ss:$16 sps:$4 sm:$0xff]   ;;  %v1128_v20 = vld [vmem:[%s1667_s1 + $0xa4] ss:$16 sps:$4 sm:$0xff]  }
   0x8   :  { %361 = vmatprep.subr.bf16.mxu0 %v1110_v8  ;;  %402 = vmatprep.subr.bf16.mxu1 %v1112_v9  ;;  %v1130_v21 = vld [vmem:[%s1667_s1 + $0xac] ss:$16 sps:$4 sm:$0xff]   ;;  %v1132_v22 = vld [vmem:[%s1667_s1 + $0xa0] ss:$16 sps:$4 sm:$0xff]   ;;  %v1133_v23 = vld [vmem:[%s1667_s1 + $0xa8] ss:$16 sps:$4 sm:$0xff]  }
   0x9   :  { %v1134_v24 = vld [vmem:[%s1667_s1 + $0xc4] ss:$16 sps:$4 sm:$0xff]   ;;  %v1136_v25 = vld [vmem:[%s1667_s1 + $0xcc] ss:$16 sps:$4 sm:$0xff]   ;;  %v1138_v26 = vld [vmem:[%s1667_s1 + $0xc0] ss:$16 sps:$4 sm:$0xff]  }
   0xa   :  { %v1139_v27 = vld [vmem:[%s1667_s1 + $0xc8] ss:$16 sps:$4 sm:$0xff]   ;;  %v1140_v28 = vld [vmem:[%s1667_s1 + $0xe4] ss:$16 sps:$4 sm:$0xff]   ;;  %v1142_v29 = vld [vmem:[%s1667_s1 + $0xec] ss:$16 sps:$4 sm:$0xff]  }
   0xb   :  { %362 = vmatpush1.bf16.msra.mxu0 %v1114_v10  ;;  %403 = vmatpush1.bf16.msra.mxu1 %v1115_v11  ;;  %v1144_v30 = vld [vmem:[%s1667_s1 + $0xe0] ss:$16 sps:$4 sm:$0xff]   ;;  %v1145_v31 = vld [vmem:[%s1667_s1 + $0xe8] ss:$16 sps:$4 sm:$0xff]   ;;  %v1146_v32 = vld [vmem:[%s1667_s1 + $0x104] ss:$16 sps:$4 sm:$0xff]  }
   0xc   :  { %363 = vmatprep.subr.bf16.mxu0 %v1116_v12  ;;  %404 = vmatprep.subr.bf16.mxu1 %v1118_v13  ;;  %v1148_v33 = vld [vmem:[%s1667_s1 + $0x10c] ss:$16 sps:$4 sm:$0xff]   ;;  %v1150_v34 = vld [vmem:[%s1667_s1 + $0x100] ss:$16 sps:$4 sm:$0xff]   ;;  %v1151_v35 = vld [vmem:[%s1667_s1 + $0x108] ss:$16 sps:$4 sm:$0xff]  }
   0xd   :  { %v978_v36 = vld.sshfl [vmem:[%s1668_s0] sm:$0x33 pattern:$0x76325410]  ;;  %v1152_v37 = vld [vmem:[%s1667_s1 + $0x124] ss:$16 sps:$4 sm:$0xff]  }
   0xe   :  { %v1154_v38 = vld [vmem:[%s1667_s1 + $0x12c] ss:$16 sps:$4 sm:$0xff]   ;;  %v38_v39 = vcombine.high %v978_v36, %v978_v36  ;;  %v1156_v40 = vld [vmem:[%s1667_s1 + $0x120] ss:$16 sps:$4 sm:$0xff]   ;;  %v1157_v42 = vld [vmem:[%s1667_s1 + $0x128] ss:$16 sps:$4 sm:$0xff]   ;;  %v41_v53 = vpack.c.bf16 %v978_v36, %v978_v36 }
   0xf   :  { %364 = vmatpush1.bf16.msra.mxu0 %v1120_v14  ;;  %405 = vmatpush1.bf16.msra.mxu1 %v1121_v15  ;;  %v1158_v43 = vld [vmem:[%s1667_s1 + $0x144] ss:$16 sps:$4 sm:$0xff]   ;;  %v1160_v44 = vld [vmem:[%s1667_s1 + $0x14c] ss:$16 sps:$4 sm:$0xff]   ;;  %v1162_v45 = vld [vmem:[%s1667_s1 + $0x140] ss:$16 sps:$4 sm:$0xff]  }
  0x10   :  { %365 = vmatprep.subr.bf16.mxu0 %v1122_v16  ;;  %406 = vmatprep.subr.bf16.mxu1 %v1124_v17  ;;  %v42_v41 = vpack.c.bf16 %v38_v39, %v38_v39  ;;  %v1163_v46 = vld [vmem:[%s1667_s1 + $0x148] ss:$16 sps:$4 sm:$0xff]   ;;  %v1164_v47 = vld [vmem:[%s1667_s1 + $0x164] ss:$16 sps:$4 sm:$0xff]   ;;  %v1166_v48 = vld [vmem:[%s1667_s1 + $0x16c] ss:$16 sps:$4 sm:$0xff]  }
  0x11   :  { %v1168_v49 = vld [vmem:[%s1667_s1 + $0x160] ss:$16 sps:$4 sm:$0xff]   ;;  %v1169_v50 = vld [vmem:[%s1667_s1 + $0x168] ss:$16 sps:$4 sm:$0xff]   ;;  %v1172_v51 = vld [vmem:[%s1669_s3 + $0x4] ss:$8 sps:$4 sm:$0xff]  }
  0x12   :  { %1027 = vmatprep.mubr.msk.bf16.mxu0 %vm353_vm0, %v42_v41  ;;  %1028 = vmatprep.mubr.msk.bf16.mxu1 %vm353_vm0, %v42_v41  ;;  %v1175_v52 = vld [vmem:[%s1669_s3 + $0x104] ss:$8 sps:$4 sm:$0xff]   ;;  %v1170_v54 = vld [vmem:[%s1669_s3] ss:$8 sps:$4 sm:$0xff]   ;;  %v1178_v56 = vld [vmem:[%s1669_s3 + $0x14] ss:$8 sps:$4 sm:$0xff]  }
  0x13   :  { %366 = vmatpush1.bf16.msra.mxu0 %v1126_v18  ;;  %407 = vmatpush1.bf16.msra.mxu1 %v1127_v19  ;;  %v1173_v55 = vld [vmem:[%s1669_s3 + $0x100] ss:$8 sps:$4 sm:$0xff]   ;;  %v1181_v57 = vld [vmem:[%s1669_s3 + $0x114] ss:$8 sps:$4 sm:$0xff]   ;;  %v1176_v58 = vld [vmem:[%s1669_s3 + $0x10] ss:$8 sps:$4 sm:$0xff]  }
  0x14   :  { %367 = vmatprep.subr.bf16.mxu0 %v1128_v20  ;;  %408 = vmatprep.subr.bf16.mxu1 %v1130_v21  ;;  %v1179_v59 = vld [vmem:[%s1669_s3 + $0x110] ss:$8 sps:$4 sm:$0xff]   ;;  %v1184_v60 = vld [vmem:[%s1669_s3 + $0x24] ss:$8 sps:$4 sm:$0xff]   ;;  %v1182_v62 = vld [vmem:[%s1669_s3 + $0x20] ss:$8 sps:$4 sm:$0xff]  }
  0x15   :  { %v1187_v61 = vld [vmem:[%s1669_s3 + $0x124] ss:$8 sps:$4 sm:$0xff]   ;;  %v1185_v63 = vld [vmem:[%s1669_s3 + $0x120] ss:$8 sps:$4 sm:$0xff]   ;;  %v1190_v0 = vld [vmem:[%s1669_s3 + $0x34] ss:$8 sps:$4 sm:$0xff]  }
  0x16   :  { %v1193_v1 = vld [vmem:[%s1669_s3 + $0x134] ss:$8 sps:$4 sm:$0xff]   ;;  %v1188_v2 = vld [vmem:[%s1669_s3 + $0x30] ss:$8 sps:$4 sm:$0xff]   ;;  %v1196_v4 = vld [vmem:[%s1669_s3 + $0x44] ss:$8 sps:$4 sm:$0xff]  }
  0x17   :  { %368 = vmatpush1.bf16.msra.mxu0 %v1132_v22  ;;  %409 = vmatpush1.bf16.msra.mxu1 %v1133_v23  ;;  %v1191_v3 = vld [vmem:[%s1669_s3 + $0x130] ss:$8 sps:$4 sm:$0xff]   ;;  %v1199_v5 = vld [vmem:[%s1669_s3 + $0x144] ss:$8 sps:$4 sm:$0xff]   ;;  %v1194_v6 = vld [vmem:[%s1669_s3 + $0x40] ss:$8 sps:$4 sm:$0xff]  }
  0x18   :  { %369 = vmatprep.subr.bf16.mxu0 %v1134_v24  ;;  %410 = vmatprep.subr.bf16.mxu1 %v1136_v25  ;;  %v1197_v7 = vld [vmem:[%s1669_s3 + $0x140] ss:$8 sps:$4 sm:$0xff]   ;;  %v1202_v8 = vld [vmem:[%s1669_s3 + $0x54] ss:$8 sps:$4 sm:$0xff]   ;;  %v1200_v10 = vld [vmem:[%s1669_s3 + $0x50] ss:$8 sps:$4 sm:$0xff]  }
  0x19   :  { %v1205_v9 = vld [vmem:[%s1669_s3 + $0x154] ss:$8 sps:$4 sm:$0xff]   ;;  %v1203_v11 = vld [vmem:[%s1669_s3 + $0x150] ss:$8 sps:$4 sm:$0xff]   ;;  %v1208_v12 = vld [vmem:[%s1669_s3 + $0x64] ss:$8 sps:$4 sm:$0xff]  }
  0x1a   :  { %v1211_v13 = vld [vmem:[%s1669_s3 + $0x164] ss:$8 sps:$4 sm:$0xff]   ;;  %v1206_v14 = vld [vmem:[%s1669_s3 + $0x60] ss:$8 sps:$4 sm:$0xff]   ;;  %v1214_v16 = vld [vmem:[%s1669_s3 + $0x74] ss:$8 sps:$4 sm:$0xff]  }
  0x1b   :  { %370 = vmatpush1.bf16.msra.mxu0 %v1138_v26  ;;  %411 = vmatpush1.bf16.msra.mxu1 %v1139_v27  ;;  %v1209_v15 = vld [vmem:[%s1669_s3 + $0x160] ss:$8 sps:$4 sm:$0xff]   ;;  %v1217_v17 = vld [vmem:[%s1669_s3 + $0x174] ss:$8 sps:$4 sm:$0xff]   ;;  %v1212_v18 = vld [vmem:[%s1669_s3 + $0x70] ss:$8 sps:$4 sm:$0xff]  }
  0x1c   :  { %371 = vmatprep.subr.bf16.mxu0 %v1140_v28  ;;  %412 = vmatprep.subr.bf16.mxu1 %v1142_v29  ;;  %v1215_v19 = vld [vmem:[%s1669_s3 + $0x170] ss:$8 sps:$4 sm:$0xff]   ;;  %v1220_v20 = vld [vmem:[%s1669_s3 + $0x84] ss:$8 sps:$4 sm:$0xff]   ;;  %v1218_v22 = vld [vmem:[%s1669_s3 + $0x80] ss:$8 sps:$4 sm:$0xff]  }
  0x1d   :  { %v1223_v21 = vld [vmem:[%s1669_s3 + $0x184] ss:$8 sps:$4 sm:$0xff]   ;;  %v1221_v23 = vld [vmem:[%s1669_s3 + $0x180] ss:$8 sps:$4 sm:$0xff]   ;;  %v1226_v24 = vld [vmem:[%s1669_s3 + $0x94] ss:$8 sps:$4 sm:$0xff]  }
  0x1e   :  { %v1229_v25 = vld [vmem:[%s1669_s3 + $0x194] ss:$8 sps:$4 sm:$0xff]   ;;  %v1224_v26 = vld [vmem:[%s1669_s3 + $0x90] ss:$8 sps:$4 sm:$0xff]   ;;  %v1232_v28 = vld [vmem:[%s1669_s3 + $0xa4] ss:$8 sps:$4 sm:$0xff]  }
  0x1f   :  { %372 = vmatpush1.bf16.msra.mxu0 %v1144_v30  ;;  %413 = vmatpush1.bf16.msra.mxu1 %v1145_v31  ;;  %v1227_v27 = vld [vmem:[%s1669_s3 + $0x190] ss:$8 sps:$4 sm:$0xff]   ;;  %v1235_v29 = vld [vmem:[%s1669_s3 + $0x1a4] ss:$8 sps:$4 sm:$0xff]   ;;  %v1230_v30 = vld [vmem:[%s1669_s3 + $0xa0] ss:$8 sps:$4 sm:$0xff]  }
  0x20   :  { %373 = vmatprep.subr.bf16.mxu0 %v1146_v32  ;;  %414 = vmatprep.subr.bf16.mxu1 %v1148_v33  ;;  %v1233_v31 = vld [vmem:[%s1669_s3 + $0x1a0] ss:$8 sps:$4 sm:$0xff]   ;;  %v1238_v32 = vld [vmem:[%s1669_s3 + $0xb4] ss:$8 sps:$4 sm:$0xff]   ;;  %v1244_v36 = vld [vmem:[%s1669_s3 + $0xc4] ss:$8 sps:$4 sm:$0xff]  }
  0x21   :  { %v1241_v33 = vld [vmem:[%s1669_s3 + $0x1b4] ss:$8 sps:$4 sm:$0xff]   ;;  %v1245_v39 = vld [vmem:[%s1669_s3 + $0x1c0] ss:$8 sps:$4 sm:$0xff]  }
  0x22   :  { %v1253_v41 = vld [vmem:[%s1669_s3 + $0x1d4] ss:$8 sps:$4 sm:$0xff]  }
  0x23   :  { %374 = vmatpush1.bf16.msra.mxu0 %v1150_v34  ;;  %415 = vmatpush1.bf16.msra.mxu1 %v1151_v35  ;;  %v1236_v34 = vld [vmem:[%s1669_s3 + $0xb0] ss:$8 sps:$4 sm:$0xff]  }
  0x24   :  { %375 = vmatprep.subr.bf16.mxu0 %v1152_v37  ;;  %416 = vmatprep.subr.bf16.mxu1 %v1154_v38  ;;  %v1239_v35 = vld [vmem:[%s1669_s3 + $0x1b0] ss:$8 sps:$4 sm:$0xff]   ;;  %v1247_v37 = vld [vmem:[%s1669_s3 + $0x1c4] ss:$8 sps:$4 sm:$0xff]   ;;  %v1242_v38 = vld [vmem:[%s1669_s3 + $0xc0] ss:$8 sps:$4 sm:$0xff]  }
  0x27   :  { %376 = vmatpush1.bf16.msra.mxu0 %v1156_v40  ;;  %417 = vmatpush1.bf16.msra.mxu1 %v1157_v42  ;;  %v1250_v40 = vld [vmem:[%s1669_s3 + $0xd4] ss:$8 sps:$4 sm:$0xff]   ;;  %v1248_v42 = vld [vmem:[%s1669_s3 + $0xd0] ss:$8 sps:$4 sm:$0xff]  }
  0x28   :  { %377 = vmatprep.subr.bf16.mxu0 %v1158_v43  ;;  %418 = vmatprep.subr.bf16.mxu1 %v1160_v44  ;;  %v1251_v43 = vld [vmem:[%s1669_s3 + $0x1d0] ss:$8 sps:$4 sm:$0xff]   ;;  %v1256_v44 = vld [vmem:[%s1669_s3 + $0xe4] ss:$8 sps:$4 sm:$0xff]  }
  0x2b   :  { %378 = vmatpush1.bf16.msra.mxu0 %v1162_v45  ;;  %419 = vmatpush1.bf16.msra.mxu1 %v1163_v46  ;;  %v1259_v45 = vld [vmem:[%s1669_s3 + $0x1e4] ss:$8 sps:$4 sm:$0xff]   ;;  %v1254_v46 = vld [vmem:[%s1669_s3 + $0xe0] ss:$8 sps:$4 sm:$0xff]  }
  0x2c   :  { %379 = vmatprep.subr.bf16.mxu0 %v1164_v47  ;;  %420 = vmatprep.subr.bf16.mxu1 %v1166_v48  ;;  %v1257_v47 = vld [vmem:[%s1669_s3 + $0x1e0] ss:$8 sps:$4 sm:$0xff]   ;;  %v1262_v48 = vld [vmem:[%s1669_s3 + $0xf4] ss:$8 sps:$4 sm:$0xff]  }
  0x2f   :  { %380 = vmatpush1.bf16.msra.mxu0 %v1168_v49  ;;  %421 = vmatpush1.bf16.msra.mxu1 %v1169_v50  ;;  %v1265_v49 = vld [vmem:[%s1669_s3 + $0x1f4] ss:$8 sps:$4 sm:$0xff]   ;;  %v1260_v50 = vld [vmem:[%s1669_s3 + $0xf0] ss:$8 sps:$4 sm:$0xff]  }
  0x30   :  { %847 = vmatprep.subr.bf16.mxu1 %v1172_v51  ;;  %888 = vmatprep.subr.bf16.mxu0 %v1175_v52  ;;  %v1263_v51 = vld [vmem:[%s1669_s3 + $0x1f0] ss:$8 sps:$4 sm:$0xff]   ;;  %v93_v52 = vlaneseq }
  0x32   :  { %390 = vmatmul.mubr.bf16.vlgmr.msra.gmra.mrb[0].mxu0 %v41_v53  ;;  %431 = vmatmul.mubr.bf16.vlgmr.msra.gmra.mrb[0].mxu1 %v41_v53  ;;  %v94_v53 = vshrl.u32 %v93_v52, 7 }
  0x33   :  { %848 = vmatpush1.bf16.msra.mxu1 %v1170_v54  ;;  %889 = vmatpush1.bf16.msra.mxu0 %v1173_v55 }
  0x34   :  { %849 = vmatprep.subr.bf16.mxu1 %v1178_v56  ;;  %890 = vmatprep.subr.bf16.mxu0 %v1181_v57  ;;  %v1645_v54 = vsub.s32 0, %v94_v53  ;;  %v103_v55 = vsub.s32 2, %v94_v53  ;;  %v91_v56 = vld [vmem:[%s1670_s2] sm:$0xf]  ;;  %v99_v57 = vsub.s32 1, %v94_v53 }
  0x37   :  { %850 = vmatpush1.bf16.msra.mxu1 %v1176_v58  ;;  %891 = vmatpush1.bf16.msra.mxu0 %v1179_v59  ;;  %v107_v58 = vsub.s32 3, %v94_v53  ;;  %v96_v59 = vrot.slane %v91_v56, %v1645_v54 }
  0x38   :  { %851 = vmatprep.subr.bf16.mxu1 %v1184_v60  ;;  %892 = vmatprep.subr.bf16.mxu0 %v1187_v61  ;;  %v104_v60 = vrot.slane %v91_v56, %v103_v55  ;;  %v100_v61 = vrot.slane %v91_v56, %v99_v57 }
  0x3b   :  { %852 = vmatpush1.bf16.msra.mxu1 %v1182_v62  ;;  %893 = vmatpush1.bf16.msra.mxu0 %v1185_v63  ;;  %v108_v62 = vrot.slane %v91_v56, %v107_v58 }
  0x3c   :  { %853 = vmatprep.subr.bf16.mxu1 %v1190_v0  ;;  %894 = vmatprep.subr.bf16.mxu0 %v1193_v1 }
  0x3f   :  { %854 = vmatpush1.bf16.msra.mxu1 %v1188_v2  ;;  %895 = vmatpush1.bf16.msra.mxu0 %v1191_v3 }
  0x40   :  { %855 = vmatprep.subr.bf16.mxu1 %v1196_v4  ;;  %896 = vmatprep.subr.bf16.mxu0 %v1199_v5 }
  0x43   :  { %856 = vmatpush1.bf16.msra.mxu1 %v1194_v6  ;;  %897 = vmatpush1.bf16.msra.mxu0 %v1197_v7 }
  0x44   :  { %857 = vmatprep.subr.bf16.mxu1 %v1202_v8  ;;  %898 = vmatprep.subr.bf16.mxu0 %v1205_v9 }
  0x47   :  { %858 = vmatpush1.bf16.msra.mxu1 %v1200_v10  ;;  %899 = vmatpush1.bf16.msra.mxu0 %v1203_v11 }
  0x48   :  { %859 = vmatprep.subr.bf16.mxu1 %v1208_v12  ;;  %900 = vmatprep.subr.bf16.mxu0 %v1211_v13 }
  0x4b   :  { %860 = vmatpush1.bf16.msra.mxu1 %v1206_v14  ;;  %901 = vmatpush1.bf16.msra.mxu0 %v1209_v15 }
  0x4c   :  { %861 = vmatprep.subr.bf16.mxu1 %v1214_v16  ;;  %902 = vmatprep.subr.bf16.mxu0 %v1217_v17 }
  0x4f   :  { %862 = vmatpush1.bf16.msra.mxu1 %v1212_v18  ;;  %903 = vmatpush1.bf16.msra.mxu0 %v1215_v19 }
  0x50   :  { %863 = vmatprep.subr.bf16.mxu1 %v1220_v20  ;;  %904 = vmatprep.subr.bf16.mxu0 %v1223_v21 }
  0x53   :  { %864 = vmatpush1.bf16.msra.mxu1 %v1218_v22  ;;  %905 = vmatpush1.bf16.msra.mxu0 %v1221_v23  ;;  %v12_v23 = vstv %s1671_s6 }
  0x54   :  { %865 = vmatprep.subr.bf16.mxu1 %v1226_v24  ;;  %906 = vmatprep.subr.bf16.mxu0 %v1229_v25  ;;  %13 = vst [vmem:[#allocation2] sm:$0x1] %v12_v23  ;;  %v933_v24 = vld [vmem:[%s1672_s5] sm:$0x3] }
  0x55   :  { %v515_v25 = vld [vmem:[%s1673_s4] sm:$0x3] }
  0x57   :  { %866 = vmatpush1.bf16.msra.mxu1 %v1224_v26  ;;  %907 = vmatpush1.bf16.msra.mxu0 %v1227_v27  ;;  %v934_v26 = vunpack.c.l.bf16 %v933_v24  ;;  %v520_v27 = vrot.slane %v515_v25, %v1645_v54 }
  0x58   :  { %867 = vmatprep.subr.bf16.mxu1 %v1232_v28  ;;  %908 = vmatprep.subr.bf16.mxu0 %v1235_v29  ;;  %v524_v28 = vrot.slane %v515_v25, %v99_v57 }
  0x5b   :  { %868 = vmatpush1.bf16.msra.mxu1 %v1230_v30  ;;  %909 = vmatpush1.bf16.msra.mxu0 %v1233_v31 }
  0x5c   :  { %869 = vmatprep.subr.bf16.mxu1 %v1238_v32  ;;  %910 = vmatprep.subr.bf16.mxu0 %v1241_v33 }
  0x5f   :  { %870 = vmatpush1.bf16.msra.mxu1 %v1236_v34  ;;  %911 = vmatpush1.bf16.msra.mxu0 %v1239_v35  ;;  %v939_v34 = vrot.slane %v934_v26, %v1645_v54  ;;  %v943_v35 = vrot.slane %v934_v26, %v103_v55  ;;  %v1093_v55 = vld [vmem:[#allocation2] ss:$0 sm:$0xff] }
  0x60   :  { %871 = vmatprep.subr.bf16.mxu1 %v1244_v36  ;;  %912 = vmatprep.subr.bf16.mxu0 %v1247_v37 }
  0x63   :  { %872 = vmatpush1.bf16.msra.mxu1 %v1242_v38  ;;  %913 = vmatpush1.bf16.msra.mxu0 %v1245_v39 }
  0x64   :  { %873 = vmatprep.subr.bf16.mxu1 %v1250_v40  ;;  %914 = vmatprep.subr.bf16.mxu0 %v1253_v41 }
  0x67   :  { %874 = vmatpush1.bf16.msra.mxu1 %v1248_v42  ;;  %915 = vmatpush1.bf16.msra.mxu0 %v1251_v43 }
  0x68   :  { %875 = vmatprep.subr.bf16.mxu1 %v1256_v44  ;;  %916 = vmatprep.subr.bf16.mxu0 %v1259_v45  ;;  %v949_v44 = vrot.slane %v939_v34, %v1645_v54 }
  0x6b   :  { %876 = vmatpush1.bf16.msra.mxu1 %v1254_v46  ;;  %917 = vmatpush1.bf16.msra.mxu0 %v1257_v47  ;;  %v953_v46 = vrot.slane %v943_v35, %v1645_v54 }
  0x6c   :  { %877 = vmatprep.subr.bf16.mxu1 %v1262_v48  ;;  %918 = vmatprep.subr.bf16.mxu0 %v1265_v49 }
  0x6f   :  { %878 = vmatpush1.bf16.msra.mxu1 %v1260_v50  ;;  %919 = vmatpush1.bf16.msra.mxu0 %v1263_v51 }
 0x105   :  { %v391_v63 = vpop.f32.mrb[0].mxu0  ;;  %v432_v0 = vpop.f32.mrb[0].mxu1 }
 0x106   :  { %v392_v1 = vadd.f32 %v391_v63, %v96_v59  ;;  %v433_v2 = vadd.f32 %v432_v0, %v104_v60  ;;  %v393_v3 = vpop.f32.mrb[1].mxu0  ;;  %v434_v4 = vpop.f32.mrb[1].mxu1 }
 0x107   :  { %v394_v5 = vadd.f32 %v393_v3, %v100_v61  ;;  %v435_v6 = vadd.f32 %v434_v4, %v108_v62  ;;  %v395_v7 = vpop.f32.mrb[2].mxu0  ;;  %v436_v8 = vpop.f32.mrb[2].mxu1 }
 0x108   :  { %v439_v9 = vmul.f32 0.2, %v392_v1  ;;  %v441_v10 = vmul.f32 0.2, %v433_v2  ;;  %v396_v11 = vpop.f32.mrb[3].mxu0  ;;  %v437_v12 = vpop.f32.mrb[3].mxu1 }
 0x109   :  { %v440_v13 = vmul.f32 0.2, %v394_v5  ;;  %v442_v14 = vmul.f32 0.2, %v435_v6 }
 0x10a   :  { %v443_v15 = vmax.f32 %v392_v1, %v439_v9  ;;  %v445_v16 = vmax.f32 %v433_v2, %v441_v10 }
 0x10b   :  { %v444_v17 = vmax.f32 %v394_v5, %v440_v13  ;;  %v446_v18 = vmax.f32 %v435_v6, %v442_v14 }
 0x10c   :  { %v447_v21 = vpack.c.bf16 %v443_v15, %v443_v15  ;;  %v449_v22 = vpack.c.bf16 %v445_v16, %v445_v16 }
 0x10d   :  { %v448_v19 = vpack.c.bf16 %v444_v17, %v444_v17  ;;  %v450_v20 = vpack.c.bf16 %v446_v18, %v446_v18 }
 0x10f   :  { %879 = vmatprep.mubr.bf16.mxu1 %v448_v19  ;;  %920 = vmatprep.mubr.bf16.mxu0 %v450_v20 }
 0x110   :  { %880 = vmatmul.mubr.bf16.vlgmr.msra.gmra.mrb[4].mxu1 %v447_v21  ;;  %921 = vmatmul.mubr.bf16.vlgmr.msra.gmra.mrb[4].mxu0 %v449_v22 }
 0x1e3   :  { %v881_v29 = vpop.f32.mrb[4].mxu1  ;;  %v922_v30 = vpop.f32.mrb[4].mxu0 }
 0x1e4   :  { %v882_v31 = vadd.f32 %v881_v29, %v520_v27  ;;  %v883_v32 = vpop.f32.mrb[5].mxu1  ;;  %v924_v33 = vpop.f32.mrb[5].mxu0 }
 0x1e5   :  { %v884_v36 = vadd.f32 %v883_v32, %v524_v28  ;;  %v885_v37 = vpop.f32.mrb[6].mxu1  ;;  %v926_v38 = vpop.f32.mrb[6].mxu0 }
 0x1e6   :  { %v923_v39 = vadd.f32 %v922_v30, %v882_v31  ;;  %v886_v40 = vpop.f32.mrb[7].mxu1  ;;  %v927_v41 = vpop.f32.mrb[7].mxu0 }
 0x1e7   :  { %v925_v42 = vadd.f32 %v924_v33, %v884_v36 }
 0x1e8   :  { %v929_v43 = vmul.f32 0.2, %v923_v39 }
 0x1e9   :  { %v930_v45 = vmul.f32 0.2, %v925_v42 }
 0x1ea   :  { %v931_v47 = vmax.f32 %v923_v39, %v929_v43 }
 0x1eb   :  { %v932_v48 = vmax.f32 %v925_v42, %v930_v45 }
 0x1ec   :  { %v954_v49 = vmul.f32 %v949_v44, %v931_v47 }
 0x1ed   :  { %v955_v50 = vmul.f32 %v953_v46, %v932_v48 }
 0x1ee   :  { %v957_v51 = vsel %vm956_vm1, %v954_v49, 0.0 }
 0x1ef   :  { %v958_v52 = vsel %vm956_vm1, %v955_v50, 0.0 }
 0x1f0   :  { %v959_v53 = vadd.f32 %v958_v52, %v957_v51 }
 0x1f2   :  { %960 = vadd.xlane.f32.xlu0 %v959_v53 }
 0x27f   :  { %v961_v56 = vpop.xlane.xlu0 %960 }
 0x280   :  { %v969_v57 = vadd.f32 %v1093_v55, %v961_v56 }
 0x282   :  { %v970_v58 = vmul.f32 0.2, %v969_v57 }
 0x284   :  { %v971_v59 = vmax.f32 %v969_v57, %v970_v58 }
 0x286   :  { %973 = vst.msk [vmem:[%s1674_s7] sm:$0x3] %vm972_vm2, %v971_v59 }

</bundles_post_ra>
